<compile_context>
chip_gen: v6e
topology: v6e:2x2x1
jax: 0.10.0
libtpu: 0.0.40
codegen_flags: <defaults>
</compile_context>

<pallas_src>
import jax
import jax.numpy as jnp
from jax.experimental import pallas as pl
from jax.experimental.pallas import tpu as pltpu

# Packed-parameter layout (row-major PyTorch Linear weights: w[out, in]).
W1_OFF, B1_OFF = 0, 12       # w1: (4,3) -> 12, b1: 4
W2_OFF, B2_OFF = 16, 32      # w2: (4,4) -> 16, b2: 4
W3_OFF, B3_OFF = 36, 44      # w3: (2,4) ->  8, b3: 2
N_PARAMS = 46


def mlp_kernel(p_ref, x_ref, o_ref):
    """p_ref: (46,) f32 in SMEM. x_ref: (3, TB) VMEM (batch on lanes). o_ref: (2, TB) VMEM."""
    # Input rows: feature k as a lane-dense vector over the batch tile.
    xr = [x_ref[k, :] for k in range(3)]

    # Layer 1: 3 -> 4, scalar-weight * vector FMAs on the VPU, then ReLU.
    h1 = []
    for j in range(4):
        acc = p_ref[B1_OFF + j] + xr[0] * p_ref[W1_OFF + j * 3 + 0]
        acc = acc + xr[1] * p_ref[W1_OFF + j * 3 + 1]
        acc = acc + xr[2] * p_ref[W1_OFF + j * 3 + 2]
        h1.append(jnp.maximum(acc, 0.0))

    # Layer 2: 4 -> 4.
    h2 = []
    for j in range(4):
        acc = p_ref[B2_OFF + j] + h1[0] * p_ref[W2_OFF + j * 4 + 0]
        acc = acc + h1[1] * p_ref[W2_OFF + j * 4 + 1]
        acc = acc + h1[2] * p_ref[W2_OFF + j * 4 + 2]
        acc = acc + h1[3] * p_ref[W2_OFF + j * 4 + 3]
        h2.append(jnp.maximum(acc, 0.0))

    # Layer 3: 4 -> 2, ReLU, lane-dense store (one full sublane row per output feature).
    for j in range(2):
        acc = p_ref[B3_OFF + j] + h2[0] * p_ref[W3_OFF + j * 4 + 0]
        acc = acc + h2[1] * p_ref[W3_OFF + j * 4 + 1]
        acc = acc + h2[2] * p_ref[W3_OFF + j * 4 + 2]
        acc = acc + h2[3] * p_ref[W3_OFF + j * 4 + 3]
        o_ref[j, :] = jnp.maximum(acc, 0.0)


def pack_params(params):
    """Pack all weights/biases (PyTorch Linear layout, row-major) into one f32 vector.

    Call this ONCE at init and reuse the result; no per-call transposes/reshapes remain.
    """
    packed = jnp.concatenate([
        params["w1"].reshape(-1),   # (4,3): w1[j*3 + k] = weight in->k, out->j
        params["b1"].reshape(-1),
        params["w2"].reshape(-1),   # (4,4)
        params["b2"].reshape(-1),
        params["w3"].reshape(-1),   # (2,4)
        params["b3"].reshape(-1),
    ]).astype(jnp.float32)
    assert packed.shape == (N_PARAMS,)
    return packed


def mlp_forward(x, packed_params, *, tb=512):
    """x: (B, 3) float32. packed_params: (46,) float32 from pack_params(). Returns (B, 2)."""
    B = x.shape[0]
    b_pad = pl.cdiv(B, tb) * tb                     # lane tile: multiple of 128
    # Batch-on-lanes layout: (3, B) padded with zero columns up to b_pad.
    x_t = jnp.pad(x.astype(jnp.float32).T, ((0, 0), (0, b_pad - B)))

    out_t = pl.pallas_call(
        mlp_kernel,
        out_shape=jax.ShapeDtypeStruct((2, b_pad), jnp.float32),
        grid=(b_pad // tb,),
        in_specs=[
            # Whole (tiny) parameter vector lives in SMEM, resident across grid steps.
            pl.BlockSpec(memory_space=pltpu.MemorySpace.SMEM),
            # Lane-dense batch tiles of the transposed input.
            pl.BlockSpec((3, tb), lambda i: (0, i)),
        ],
        out_specs=pl.BlockSpec((2, tb), lambda i: (0, i)),
        compiler_params=pltpu.CompilerParams(
            dimension_semantics=("parallel",),      # shard batch tiles across TCs on v7x
        ),
    )(packed_params, x_t)

    return out_t[:, :B].T                           # back to (B, 2)


def _orthogonal(key, shape):
    # Deterministic orthogonal init (mimics torch.nn.init.orthogonal_).
    rows, cols = shape
    n = max(rows, cols)
    a = jax.random.normal(key, (n, n), dtype=jnp.float32)
    q, r = jnp.linalg.qr(a)
    q = q * jnp.sign(jnp.diag(r))
    return q[:rows, :cols].astype(jnp.float32)


def init_params(key):
    k1, k2, k3, k4, k5, k6 = jax.random.split(key, 6)
    return {
        "w1": _orthogonal(k1, (4, 3)),  # nn.Linear(3, 4).weight -> (out, in)
        "b1": jax.random.uniform(k4, (4,), minval=-1.0 / jnp.sqrt(3.0),
                                 maxval=1.0 / jnp.sqrt(3.0), dtype=jnp.float32),
        "w2": _orthogonal(k2, (4, 4)),  # nn.Linear(4, 4).weight
        "b2": jax.random.uniform(k5, (4,), minval=-0.5, maxval=0.5, dtype=jnp.float32),
        "w3": _orthogonal(k3, (2, 4)),  # nn.Linear(4, 2).weight
        "b3": jax.random.uniform(k6, (2,), minval=-0.5, maxval=0.5, dtype=jnp.float32),
    }


def reference_forward(x, params):
    h1 = jnp.maximum(x @ params["w1"].T + params["b1"], 0.0)
    h2 = jnp.maximum(h1 @ params["w2"].T + params["b2"], 0.0)
    h3 = jnp.maximum(h2 @ params["w3"].T + params["b3"], 0.0)
    return h3


if __name__ == "__main__":
    key = jax.random.PRNGKey(0)
    kx, kp = jax.random.split(key)
    B = 8
    x = jax.random.normal(kx, (B, 3), dtype=jnp.float32)
    params = init_params(kp)
    packed = pack_params(params)          # hoisted out of the per-call path

    out = mlp_forward(x, packed)
    out = jax.block_until_ready(out)

    ref = reference_forward(x, params)
    assert out.shape == (B, 2)
    assert jnp.allclose(out, ref, atol=1e-5, rtol=1e-5)
    print("KERNEL_OK")
</pallas_src>

<mosaic_0001>
module attributes {stable_mosaic.version = 11 : i64} {
  func.func @mlp_kernel(%arg0: i32, %arg1: memref<46xf32, #tpu.memory_space<smem>>, %arg2: memref<3x512xf32, #tpu.memory_space<vmem>>, %arg3: memref<2x512xf32, #tpu.memory_space<vmem>>) attributes {dimension_semantics = [#tpu.dimension_semantics<parallel>], iteration_bounds = array<i64: 1>, scalar_prefetch = 0 : i64, scratch_operands = 0 : i64, tpu.core_type = #tpu.core_type<tc>, window_params = [{transform_indices = @transform_0, window_bounds = array<i64: 46>}, {transform_indices = @transform_1, window_bounds = array<i64: 3, 512>}, {transform_indices = @transform_2, window_bounds = array<i64: 2, 512>}]} {
    %c0 = arith.constant 0 : index
    %c0_0 = arith.constant 0 : index
    %0 = vector.load %arg2[%c0, %c0_0] : memref<3x512xf32, #tpu.memory_space<vmem>>, vector<1x512xf32>
    %1 = vector.shape_cast %0 : vector<1x512xf32> to vector<512xf32>
    %c1 = arith.constant 1 : index
    %c0_1 = arith.constant 0 : index
    %2 = vector.load %arg2[%c1, %c0_1] : memref<3x512xf32, #tpu.memory_space<vmem>>, vector<1x512xf32>
    %3 = vector.shape_cast %2 : vector<1x512xf32> to vector<512xf32>
    %c2 = arith.constant 2 : index
    %c0_2 = arith.constant 0 : index
    %4 = vector.load %arg2[%c2, %c0_2] : memref<3x512xf32, #tpu.memory_space<vmem>>, vector<1x512xf32>
    %5 = vector.shape_cast %4 : vector<1x512xf32> to vector<512xf32>
    %c12 = arith.constant 12 : index
    %6 = memref.load %arg1[%c12] : memref<46xf32, #tpu.memory_space<smem>>
    %c0_3 = arith.constant 0 : index
    %7 = memref.load %arg1[%c0_3] : memref<46xf32, #tpu.memory_space<smem>>
    %8 = vector.broadcast %7 : f32 to vector<512xf32>
    %9 = arith.mulf %1, %8 : vector<512xf32>
    %10 = vector.broadcast %6 : f32 to vector<512xf32>
    %11 = arith.addf %10, %9 : vector<512xf32>
    %c1_4 = arith.constant 1 : index
    %12 = memref.load %arg1[%c1_4] : memref<46xf32, #tpu.memory_space<smem>>
    %13 = vector.broadcast %12 : f32 to vector<512xf32>
    %14 = arith.mulf %3, %13 : vector<512xf32>
    %15 = arith.addf %11, %14 : vector<512xf32>
    %c2_5 = arith.constant 2 : index
    %16 = memref.load %arg1[%c2_5] : memref<46xf32, #tpu.memory_space<smem>>
    %17 = vector.broadcast %16 : f32 to vector<512xf32>
    %18 = arith.mulf %5, %17 : vector<512xf32>
    %19 = arith.addf %15, %18 : vector<512xf32>
    %cst = arith.constant 0.000000e+00 : f32
    %20 = vector.broadcast %cst : f32 to vector<512xf32>
    %21 = arith.maximumf %19, %20 : vector<512xf32>
    %c13 = arith.constant 13 : index
    %22 = memref.load %arg1[%c13] : memref<46xf32, #tpu.memory_space<smem>>
    %c3 = arith.constant 3 : index
    %23 = memref.load %arg1[%c3] : memref<46xf32, #tpu.memory_space<smem>>
    %24 = vector.broadcast %23 : f32 to vector<512xf32>
    %25 = arith.mulf %1, %24 : vector<512xf32>
    %26 = vector.broadcast %22 : f32 to vector<512xf32>
    %27 = arith.addf %26, %25 : vector<512xf32>
    %c4 = arith.constant 4 : index
    %28 = memref.load %arg1[%c4] : memref<46xf32, #tpu.memory_space<smem>>
    %29 = vector.broadcast %28 : f32 to vector<512xf32>
    %30 = arith.mulf %3, %29 : vector<512xf32>
    %31 = arith.addf %27, %30 : vector<512xf32>
    %c5 = arith.constant 5 : index
    %32 = memref.load %arg1[%c5] : memref<46xf32, #tpu.memory_space<smem>>
    %33 = vector.broadcast %32 : f32 to vector<512xf32>
    %34 = arith.mulf %5, %33 : vector<512xf32>
    %35 = arith.addf %31, %34 : vector<512xf32>
    %cst_6 = arith.constant 0.000000e+00 : f32
    %36 = vector.broadcast %cst_6 : f32 to vector<512xf32>
    %37 = arith.maximumf %35, %36 : vector<512xf32>
    %c14 = arith.constant 14 : index
    %38 = memref.load %arg1[%c14] : memref<46xf32, #tpu.memory_space<smem>>
    %c6 = arith.constant 6 : index
    %39 = memref.load %arg1[%c6] : memref<46xf32, #tpu.memory_space<smem>>
    %40 = vector.broadcast %39 : f32 to vector<512xf32>
    %41 = arith.mulf %1, %40 : vector<512xf32>
    %42 = vector.broadcast %38 : f32 to vector<512xf32>
    %43 = arith.addf %42, %41 : vector<512xf32>
    %c7 = arith.constant 7 : index
    %44 = memref.load %arg1[%c7] : memref<46xf32, #tpu.memory_space<smem>>
    %45 = vector.broadcast %44 : f32 to vector<512xf32>
    %46 = arith.mulf %3, %45 : vector<512xf32>
    %47 = arith.addf %43, %46 : vector<512xf32>
    %c8 = arith.constant 8 : index
    %48 = memref.load %arg1[%c8] : memref<46xf32, #tpu.memory_space<smem>>
    %49 = vector.broadcast %48 : f32 to vector<512xf32>
    %50 = arith.mulf %5, %49 : vector<512xf32>
    %51 = arith.addf %47, %50 : vector<512xf32>
    %cst_7 = arith.constant 0.000000e+00 : f32
    %52 = vector.broadcast %cst_7 : f32 to vector<512xf32>
    %53 = arith.maximumf %51, %52 : vector<512xf32>
    %c15 = arith.constant 15 : index
    %54 = memref.load %arg1[%c15] : memref<46xf32, #tpu.memory_space<smem>>
    %c9 = arith.constant 9 : index
    %55 = memref.load %arg1[%c9] : memref<46xf32, #tpu.memory_space<smem>>
    %56 = vector.broadcast %55 : f32 to vector<512xf32>
    %57 = arith.mulf %1, %56 : vector<512xf32>
    %58 = vector.broadcast %54 : f32 to vector<512xf32>
    %59 = arith.addf %58, %57 : vector<512xf32>
    %c10 = arith.constant 10 : index
    %60 = memref.load %arg1[%c10] : memref<46xf32, #tpu.memory_space<smem>>
    %61 = vector.broadcast %60 : f32 to vector<512xf32>
    %62 = arith.mulf %3, %61 : vector<512xf32>
    %63 = arith.addf %59, %62 : vector<512xf32>
    %c11 = arith.constant 11 : index
    %64 = memref.load %arg1[%c11] : memref<46xf32, #tpu.memory_space<smem>>
    %65 = vector.broadcast %64 : f32 to vector<512xf32>
    %66 = arith.mulf %5, %65 : vector<512xf32>
    %67 = arith.addf %63, %66 : vector<512xf32>
    %cst_8 = arith.constant 0.000000e+00 : f32
    %68 = vector.broadcast %cst_8 : f32 to vector<512xf32>
    %69 = arith.maximumf %67, %68 : vector<512xf32>
    %c32 = arith.constant 32 : index
    %70 = memref.load %arg1[%c32] : memref<46xf32, #tpu.memory_space<smem>>
    %c16 = arith.constant 16 : index
    %71 = memref.load %arg1[%c16] : memref<46xf32, #tpu.memory_space<smem>>
    %72 = vector.broadcast %71 : f32 to vector<512xf32>
    %73 = arith.mulf %21, %72 : vector<512xf32>
    %74 = vector.broadcast %70 : f32 to vector<512xf32>
    %75 = arith.addf %74, %73 : vector<512xf32>
    %c17 = arith.constant 17 : index
    %76 = memref.load %arg1[%c17] : memref<46xf32, #tpu.memory_space<smem>>
    %77 = vector.broadcast %76 : f32 to vector<512xf32>
    %78 = arith.mulf %37, %77 : vector<512xf32>
    %79 = arith.addf %75, %78 : vector<512xf32>
    %c18 = arith.constant 18 : index
    %80 = memref.load %arg1[%c18] : memref<46xf32, #tpu.memory_space<smem>>
    %81 = vector.broadcast %80 : f32 to vector<512xf32>
    %82 = arith.mulf %53, %81 : vector<512xf32>
    %83 = arith.addf %79, %82 : vector<512xf32>
    %c19 = arith.constant 19 : index
    %84 = memref.load %arg1[%c19] : memref<46xf32, #tpu.memory_space<smem>>
    %85 = vector.broadcast %84 : f32 to vector<512xf32>
    %86 = arith.mulf %69, %85 : vector<512xf32>
    %87 = arith.addf %83, %86 : vector<512xf32>
    %cst_9 = arith.constant 0.000000e+00 : f32
    %88 = vector.broadcast %cst_9 : f32 to vector<512xf32>
    %89 = arith.maximumf %87, %88 : vector<512xf32>
    %c33 = arith.constant 33 : index
    %90 = memref.load %arg1[%c33] : memref<46xf32, #tpu.memory_space<smem>>
    %c20 = arith.constant 20 : index
    %91 = memref.load %arg1[%c20] : memref<46xf32, #tpu.memory_space<smem>>
    %92 = vector.broadcast %91 : f32 to vector<512xf32>
    %93 = arith.mulf %21, %92 : vector<512xf32>
    %94 = vector.broadcast %90 : f32 to vector<512xf32>
    %95 = arith.addf %94, %93 : vector<512xf32>
    %c21 = arith.constant 21 : index
    %96 = memref.load %arg1[%c21] : memref<46xf32, #tpu.memory_space<smem>>
    %97 = vector.broadcast %96 : f32 to vector<512xf32>
    %98 = arith.mulf %37, %97 : vector<512xf32>
    %99 = arith.addf %95, %98 : vector<512xf32>
    %c22 = arith.constant 22 : index
    %100 = memref.load %arg1[%c22] : memref<46xf32, #tpu.memory_space<smem>>
    %101 = vector.broadcast %100 : f32 to vector<512xf32>
    %102 = arith.mulf %53, %101 : vector<512xf32>
    %103 = arith.addf %99, %102 : vector<512xf32>
    %c23 = arith.constant 23 : index
    %104 = memref.load %arg1[%c23] : memref<46xf32, #tpu.memory_space<smem>>
    %105 = vector.broadcast %104 : f32 to vector<512xf32>
    %106 = arith.mulf %69, %105 : vector<512xf32>
    %107 = arith.addf %103, %106 : vector<512xf32>
    %cst_10 = arith.constant 0.000000e+00 : f32
    %108 = vector.broadcast %cst_10 : f32 to vector<512xf32>
    %109 = arith.maximumf %107, %108 : vector<512xf32>
    %c34 = arith.constant 34 : index
    %110 = memref.load %arg1[%c34] : memref<46xf32, #tpu.memory_space<smem>>
    %c24 = arith.constant 24 : index
    %111 = memref.load %arg1[%c24] : memref<46xf32, #tpu.memory_space<smem>>
    %112 = vector.broadcast %111 : f32 to vector<512xf32>
    %113 = arith.mulf %21, %112 : vector<512xf32>
    %114 = vector.broadcast %110 : f32 to vector<512xf32>
    %115 = arith.addf %114, %113 : vector<512xf32>
    %c25 = arith.constant 25 : index
    %116 = memref.load %arg1[%c25] : memref<46xf32, #tpu.memory_space<smem>>
    %117 = vector.broadcast %116 : f32 to vector<512xf32>
    %118 = arith.mulf %37, %117 : vector<512xf32>
    %119 = arith.addf %115, %118 : vector<512xf32>
    %c26 = arith.constant 26 : index
    %120 = memref.load %arg1[%c26] : memref<46xf32, #tpu.memory_space<smem>>
    %121 = vector.broadcast %120 : f32 to vector<512xf32>
    %122 = arith.mulf %53, %121 : vector<512xf32>
    %123 = arith.addf %119, %122 : vector<512xf32>
    %c27 = arith.constant 27 : index
    %124 = memref.load %arg1[%c27] : memref<46xf32, #tpu.memory_space<smem>>
    %125 = vector.broadcast %124 : f32 to vector<512xf32>
    %126 = arith.mulf %69, %125 : vector<512xf32>
    %127 = arith.addf %123, %126 : vector<512xf32>
    %cst_11 = arith.constant 0.000000e+00 : f32
    %128 = vector.broadcast %cst_11 : f32 to vector<512xf32>
    %129 = arith.maximumf %127, %128 : vector<512xf32>
    %c35 = arith.constant 35 : index
    %130 = memref.load %arg1[%c35] : memref<46xf32, #tpu.memory_space<smem>>
    %c28 = arith.constant 28 : index
    %131 = memref.load %arg1[%c28] : memref<46xf32, #tpu.memory_space<smem>>
    %132 = vector.broadcast %131 : f32 to vector<512xf32>
    %133 = arith.mulf %21, %132 : vector<512xf32>
    %134 = vector.broadcast %130 : f32 to vector<512xf32>
    %135 = arith.addf %134, %133 : vector<512xf32>
    %c29 = arith.constant 29 : index
    %136 = memref.load %arg1[%c29] : memref<46xf32, #tpu.memory_space<smem>>
    %137 = vector.broadcast %136 : f32 to vector<512xf32>
    %138 = arith.mulf %37, %137 : vector<512xf32>
    %139 = arith.addf %135, %138 : vector<512xf32>
    %c30 = arith.constant 30 : index
    %140 = memref.load %arg1[%c30] : memref<46xf32, #tpu.memory_space<smem>>
    %141 = vector.broadcast %140 : f32 to vector<512xf32>
    %142 = arith.mulf %53, %141 : vector<512xf32>
    %143 = arith.addf %139, %142 : vector<512xf32>
    %c31 = arith.constant 31 : index
    %144 = memref.load %arg1[%c31] : memref<46xf32, #tpu.memory_space<smem>>
    %145 = vector.broadcast %144 : f32 to vector<512xf32>
    %146 = arith.mulf %69, %145 : vector<512xf32>
    %147 = arith.addf %143, %146 : vector<512xf32>
    %cst_12 = arith.constant 0.000000e+00 : f32
    %148 = vector.broadcast %cst_12 : f32 to vector<512xf32>
    %149 = arith.maximumf %147, %148 : vector<512xf32>
    %c44 = arith.constant 44 : index
    %150 = memref.load %arg1[%c44] : memref<46xf32, #tpu.memory_space<smem>>
    %c36 = arith.constant 36 : index
    %151 = memref.load %arg1[%c36] : memref<46xf32, #tpu.memory_space<smem>>
    %152 = vector.broadcast %151 : f32 to vector<512xf32>
    %153 = arith.mulf %89, %152 : vector<512xf32>
    %154 = vector.broadcast %150 : f32 to vector<512xf32>
    %155 = arith.addf %154, %153 : vector<512xf32>
    %c37 = arith.constant 37 : index
    %156 = memref.load %arg1[%c37] : memref<46xf32, #tpu.memory_space<smem>>
    %157 = vector.broadcast %156 : f32 to vector<512xf32>
    %158 = arith.mulf %109, %157 : vector<512xf32>
    %159 = arith.addf %155, %158 : vector<512xf32>
    %c38 = arith.constant 38 : index
    %160 = memref.load %arg1[%c38] : memref<46xf32, #tpu.memory_space<smem>>
    %161 = vector.broadcast %160 : f32 to vector<512xf32>
    %162 = arith.mulf %129, %161 : vector<512xf32>
    %163 = arith.addf %159, %162 : vector<512xf32>
    %c39 = arith.constant 39 : index
    %164 = memref.load %arg1[%c39] : memref<46xf32, #tpu.memory_space<smem>>
    %165 = vector.broadcast %164 : f32 to vector<512xf32>
    %166 = arith.mulf %149, %165 : vector<512xf32>
    %167 = arith.addf %163, %166 : vector<512xf32>
    %cst_13 = arith.constant 0.000000e+00 : f32
    %168 = vector.broadcast %cst_13 : f32 to vector<512xf32>
    %169 = arith.maximumf %167, %168 : vector<512xf32>
    %c0_14 = arith.constant 0 : index
    %c0_15 = arith.constant 0 : index
    %170 = vector.load %arg3[%c0_14, %c0_15] : memref<2x512xf32, #tpu.memory_space<vmem>>, vector<1x512xf32>
    %171 = vector.shape_cast %170 : vector<1x512xf32> to vector<512xf32>
    %172 = vector.shape_cast %169 : vector<512xf32> to vector<1x512xf32>
    tpu.vector_store %arg3[%c0_14, %c0_15], %172 {strides = array<i32>} : memref<2x512xf32, #tpu.memory_space<vmem>>, vector<1x512xf32>,
    %c45 = arith.constant 45 : index
    %173 = memref.load %arg1[%c45] : memref<46xf32, #tpu.memory_space<smem>>
    %c40 = arith.constant 40 : index
    %174 = memref.load %arg1[%c40] : memref<46xf32, #tpu.memory_space<smem>>
    %175 = vector.broadcast %174 : f32 to vector<512xf32>
    %176 = arith.mulf %89, %175 : vector<512xf32>
    %177 = vector.broadcast %173 : f32 to vector<512xf32>
    %178 = arith.addf %177, %176 : vector<512xf32>
    %c41 = arith.constant 41 : index
    %179 = memref.load %arg1[%c41] : memref<46xf32, #tpu.memory_space<smem>>
    %180 = vector.broadcast %179 : f32 to vector<512xf32>
    %181 = arith.mulf %109, %180 : vector<512xf32>
    %182 = arith.addf %178, %181 : vector<512xf32>
    %c42 = arith.constant 42 : index
    %183 = memref.load %arg1[%c42] : memref<46xf32, #tpu.memory_space<smem>>
    %184 = vector.broadcast %183 : f32 to vector<512xf32>
    %185 = arith.mulf %129, %184 : vector<512xf32>
    %186 = arith.addf %182, %185 : vector<512xf32>
    %c43 = arith.constant 43 : index
    %187 = memref.load %arg1[%c43] : memref<46xf32, #tpu.memory_space<smem>>
    %188 = vector.broadcast %187 : f32 to vector<512xf32>
    %189 = arith.mulf %149, %188 : vector<512xf32>
    %190 = arith.addf %186, %189 : vector<512xf32>
    %cst_16 = arith.constant 0.000000e+00 : f32
    %191 = vector.broadcast %cst_16 : f32 to vector<512xf32>
    %192 = arith.maximumf %190, %191 : vector<512xf32>
    %c1_17 = arith.constant 1 : index
    %c0_18 = arith.constant 0 : index
    %193 = vector.load %arg3[%c1_17, %c0_18] : memref<2x512xf32, #tpu.memory_space<vmem>>, vector<1x512xf32>
    %194 = vector.shape_cast %193 : vector<1x512xf32> to vector<512xf32>
    %195 = vector.shape_cast %192 : vector<512xf32> to vector<1x512xf32>
    tpu.vector_store %arg3[%c1_17, %c0_18], %195 {strides = array<i32>} : memref<2x512xf32, #tpu.memory_space<vmem>>, vector<1x512xf32>,
    return
  }
  func.func @transform_0(%arg0: i32) -> i32 {
    %c0_i32 = arith.constant 0 : i32
    %c0_i32_0 = arith.constant 0 : i32
    return %c0_i32 : i32
  }
  func.func @transform_1(%arg0: i32) -> (i32, i32) {
    %c0_i32 = arith.constant 0 : i32
    %c0_i32_0 = arith.constant 0 : i32
    return %c0_i32, %arg0 : i32, i32
  }
  func.func @transform_2(%arg0: i32) -> (i32, i32) {
    %c0_i32 = arith.constant 0 : i32
    %c0_i32_0 = arith.constant 0 : i32
    return %c0_i32, %arg0 : i32, i32
  }
}

</mosaic_0001>

<bundles_post_ra>
// kernel: tpu_custom_call.1
= control target key start
LH: loop header
LB: loop body
LE: loop exit
PB: predicated region body
PF: predicated region fallthrough
CT: control target
= control target key end

     0   :  { %7 = vsyncpa [#allocation5], 0  ;;  %s414_s0 = inlined_call_operand.hbm [shape: f32[46], index: 0, kind: input, shape index: {}]   ;;  %s415_s1 = inlined_call_operand.hbm [shape: f32[3,512], index: 1, kind: input, shape index: {}]   ;;  %s416_s2 = inlined_call_operand.hbm [shape: f32[2,512], index: 2, kind: output, shape index: {}]  }
   0x1   :  { %8 = vsyncpa [#allocation3], 0 }
   0x2   :  { %9 = vsyncpa [#allocation4], 0  ;;  %s339_s9 = smov [#allocation2]   ;;  %s340_s12 = smov [#allocation6]  }
   0x3   :  { %17 = dma.hbm_to_smem %s414_s0, 16, %s339_s9, [#allocation5]  }
   0x4   :  { %s24_s13 = sshll.u32 %s340_s12, 4  ;;  %s25_s13 = int_to_ptr.vmem [resolvable:$true] %s24_s13 }
   0x5   :  { %s301_s14 = scalar_lea.vmem %s25_s13, 256  ;;  %p306_p1 = scmp.lt.s32.totalorder %s25_s13, %s25_s13 }
   0x6   :  { %p302_p0 = scmp.ne.s32.totalorder %s25_s13, %s301_s14  ;;  %p307_p2 = scmp.lt.s32.totalorder %s301_s14, %s301_s14 }
   0x8   :  { %p308_p3 = por %p307_p2, %p306_p1 }
   0xa   :  { %p309_p4 = pnand %p308_p3, %p302_p0 }
   0xc   :  { %312 = shalt.err (!%p309_p4)
}
   0xd   :  { %27 = dma.hbm_to_vmem [thread:$0]  %s415_s1, 256, %s25_s13, [#allocation3]  }
   0xe   :  { %333 = dma.done.wait [#allocation5], 16  }
   0xf   :  { %334 = vsyncadd [#allocation5], 4294967280 }
  0x10   :  { %335 = dma.done.wait [#allocation3], 256  }
  0x11   :  { %336 = vsyncadd [#allocation3], 4294967040 }
  0x12   :  { %34 = sfence }
  0x13   :  { %s237_s0 = sld [smem:[#allocation2 + $0xc]]  ;;  %v35_v0 = vld [vmem:[#allocation6] ss:$4 sm:$0xf] }
  0x14   :  { %s41_s17 = sld [smem:[#allocation2]]  ;;  %v37_v1 = vld [vmem:[#allocation6 + $0x1] ss:$4 sm:$0xf] }
  0x15   :  { %s238_s18 = sld [smem:[#allocation2 + $0x1]]  ;;  %v39_v6 = vld [vmem:[#allocation6 + $0x2] ss:$4 sm:$0xf] }
  0x16   :  { %s239_s19 = sld [smem:[#allocation2 + $0x2]] }
  0x17   :  { %s240_s20 = sld [smem:[#allocation2 + $0xd]] }
  0x18   :  { %s241_s21 = sld [smem:[#allocation2 + $0x3]] }
  0x19   :  { %s242_s22 = sld [smem:[#allocation2 + $0x4]]  ;;  %v44_v3 = vstv %s237_s0 }
  0x1a   :  { %v42_v2 = vstv %s41_s17  ;;  %s243_s23 = sld [smem:[#allocation2 + $0x5]] }
  0x1b   :  { %v43_v4 = vmul.f32 %v42_v2, %v35_v0  ;;  %v47_v5 = vstv %s238_s18  ;;  %s363_s1 = sld [smem:[#allocation2 + $0xe]] }
  0x1c   :  { %v48_v7 = vmul.f32 %v47_v5, %v37_v1  ;;  %v51_v8 = vstv %s239_s19  ;;  %s245_s24 = sld [smem:[#allocation2 + $0x6]] }
  0x1d   :  { %v45_v9 = vadd.f32 %v44_v3, %v43_v4  ;;  %s246_s25 = sld [smem:[#allocation2 + $0x7]]  ;;  %v59_v11 = vstv %s240_s20  ;;  %v52_v13 = vmul.f32 %v51_v8, %v39_v6 }
  0x1e   :  { %v57_v10 = vstv %s241_s21  ;;  %s247_s26 = sld [smem:[#allocation2 + $0x8]] }
  0x1f   :  { %v49_v12 = vadd.f32 %v48_v7, %v45_v9  ;;  %v58_v14 = vmul.f32 %v57_v10, %v35_v0  ;;  %v62_v15 = vstv %s242_s22  ;;  %s365_s27 = sld [smem:[#allocation2 + $0xf]] }
  0x20   :  { %v63_v16 = vmul.f32 %v62_v15, %v37_v1  ;;  %v66_v17 = vstv %s243_s23  ;;  %s249_s28 = sld [smem:[#allocation2 + $0x9]] }
  0x21   :  { %v60_v18 = vadd.f32 %v59_v11, %v58_v14  ;;  %v67_v19 = vmul.f32 %v66_v17, %v39_v6  ;;  %s250_s29 = sld [smem:[#allocation2 + $0xa]]  ;;  %v74_v21 = vstv %s363_s1  ;;  %v53_v22 = vadd.f32 %v52_v13, %v49_v12 }
  0x22   :  { %v72_v20 = vstv %s245_s24  ;;  %s251_s30 = sld [smem:[#allocation2 + $0xb]] }
  0x23   :  { %v64_v23 = vadd.f32 %v63_v16, %v60_v18  ;;  %v73_v24 = vmul.f32 %v72_v20, %v35_v0  ;;  %v77_v25 = vstv %s246_s25  ;;  %s368_s3 = sld [smem:[#allocation2 + $0x20]]  ;;  %v371_v33 = vmax.f32 %v53_v22, 0.0 }
  0x24   :  { %v78_v26 = vmul.f32 %v77_v25, %v37_v1  ;;  %v81_v27 = vstv %s247_s26  ;;  %s253_s4 = sld [smem:[#allocation2 + $0x10]] }
  0x25   :  { %v68_v28 = vadd.f32 %v67_v19, %v64_v23  ;;  %v75_v29 = vadd.f32 %v74_v21, %v73_v24  ;;  %v82_v30 = vmul.f32 %v81_v27, %v39_v6  ;;  %s254_s5 = sld [smem:[#allocation2 + $0x11]]  ;;  %v89_v32 = vstv %s365_s27 }
  0x26   :  { %v87_v31 = vstv %s249_s28  ;;  %s255_s6 = sld [smem:[#allocation2 + $0x12]] }
  0x27   :  { %v79_v34 = vadd.f32 %v78_v26, %v75_v29  ;;  %v88_v35 = vmul.f32 %v87_v31, %v35_v0  ;;  %v92_v36 = vstv %s250_s29  ;;  %s373_s7 = sld [smem:[#allocation2 + $0x13]]  ;;  %v375_v37 = vmax.f32 %v68_v28, 0.0 }
  0x28   :  { %v93_v38 = vmul.f32 %v92_v36, %v37_v1  ;;  %v96_v39 = vstv %s251_s30  ;;  %s377_s8 = sld [smem:[#allocation2 + $0x21]] }
  0x29   :  { %v83_v40 = vadd.f32 %v82_v30, %v79_v34  ;;  %v90_v41 = vadd.f32 %v89_v32, %v88_v35  ;;  %v97_v42 = vmul.f32 %v96_v39, %v39_v6  ;;  %s258_s9 = sld [smem:[#allocation2 + $0x14]]  ;;  %v104_v44 = vstv %s368_s3  ;;  %s341_s3 = smov [#allocation7]  }
  0x2a   :  { %v102_v43 = vstv %s253_s4  ;;  %s259_s10 = sld [smem:[#allocation2 + $0x15]]  ;;  %s227_s4 = sshll.u32 %s341_s3, 4  ;;  %s228_s4 = int_to_ptr.vmem [resolvable:$true] %s227_s4 }
  0x2b   :  { %v380_v45 = vmax.f32 %v83_v40, 0.0  ;;  %v94_v46 = vadd.f32 %v93_v38, %v90_v41  ;;  %v103_v47 = vmul.f32 %v102_v43, %v371_v33  ;;  %v107_v48 = vstv %s254_s5  ;;  %s260_s11 = sld [smem:[#allocation2 + $0x16]]  ;;  %s313_s5 = scalar_lea.vmem %s228_s4, 128 }
  0x2c   :  { %v108_v49 = vmul.f32 %v107_v48, %v375_v37  ;;  %v111_v50 = vstv %s255_s6  ;;  %s261_s12 = sld [smem:[#allocation2 + $0x17]]  ;;  %p314_p5 = scmp.ne.s32.totalorder %s228_s4, %s313_s5 }
  0x2d   :  { %v98_v51 = vadd.f32 %v97_v42, %v94_v46  ;;  %v105_v52 = vadd.f32 %v104_v44, %v103_v47  ;;  %s384_s13 = sld [smem:[#allocation2 + $0x22]]  ;;  %v112_v53 = vmul.f32 %v111_v50, %v380_v45  ;;  %v115_v58 = vstv %s373_s7  ;;  %p318_p6 = scmp.lt.s32.totalorder %s228_s4, %s228_s4 }
  0x2e   :  { %s263_s14 = sld [smem:[#allocation2 + $0x18]]  ;;  %v123_v57 = vstv %s377_s8  ;;  %p319_p7 = scmp.lt.s32.totalorder %s313_s5, %s313_s5 }
  0x2f   :  { %v99_v54 = vmax.f32 %v98_v51, 0.0  ;;  %v109_v55 = vadd.f32 %v108_v49, %v105_v52  ;;  %v121_v56 = vstv %s258_s9  ;;  %s264_s15 = sld [smem:[#allocation2 + $0x19]] }
  0x30   :  { %v122_v59 = vmul.f32 %v121_v56, %v371_v33  ;;  %v126_v60 = vstv %s259_s10  ;;  %s265_s16 = sld [smem:[#allocation2 + $0x1a]]  ;;  %p320_p8 = por %p319_p7, %p318_p6 }
  0x31   :  { %v127_v61 = vmul.f32 %v126_v60, %v375_v37  ;;  %v130_v62 = vstv %s260_s11  ;;  %s266_s0 = sld [smem:[#allocation2 + $0x1b]]  ;;  %v113_v2 = vadd.f32 %v112_v53, %v109_v55  ;;  %v116_v3 = vmul.f32 %v115_v58, %v99_v54 }
  0x32   :  { %v124_v63 = vadd.f32 %v123_v57, %v122_v59  ;;  %v131_v0 = vmul.f32 %v130_v62, %v380_v45  ;;  %v134_v1 = vstv %s261_s12  ;;  %s392_s17 = sld [smem:[#allocation2 + $0x23]]  ;;  %p321_p9 = pnand %p320_p8, %p314_p5 }
  0x33   :  { %s268_s18 = sld [smem:[#allocation2 + $0x1c]]  ;;  %v135_v5 = vmul.f32 %v134_v1, %v99_v54  ;;  %v142_v7 = vstv %s384_s13  ;;  %v117_v13 = vadd.f32 %v116_v3, %v113_v2 }
  0x34   :  { %v128_v4 = vadd.f32 %v127_v61, %v124_v63  ;;  %v140_v6 = vstv %s263_s14  ;;  %s269_s19 = sld [smem:[#allocation2 + $0x1d]] }
  0x35   :  { %v141_v8 = vmul.f32 %v140_v6, %v371_v33  ;;  %v145_v9 = vstv %s264_s15  ;;  %s270_s20 = sld [smem:[#allocation2 + $0x1e]]  ;;  %v118_v24 = vmax.f32 %v117_v13, 0.0 }
  0x36   :  { %v132_v10 = vadd.f32 %v131_v0, %v128_v4  ;;  %v146_v11 = vmul.f32 %v145_v9, %v375_v37  ;;  %v149_v12 = vstv %s265_s16  ;;  %s271_s21 = sld [smem:[#allocation2 + $0x1f]] }
  0x37   :  { %v143_v14 = vadd.f32 %v142_v7, %v141_v8  ;;  %v150_v15 = vmul.f32 %v149_v12, %v380_v45  ;;  %v153_v16 = vstv %s266_s0  ;;  %s398_s22 = sld [smem:[#allocation2 + $0x2c]] }
  0x38   :  { %v136_v17 = vadd.f32 %v135_v5, %v132_v10  ;;  %s273_s23 = sld [smem:[#allocation2 + $0x24]]  ;;  %v154_v19 = vmul.f32 %v153_v16, %v99_v54  ;;  %v161_v21 = vstv %s392_s17 }
  0x39   :  { %v147_v18 = vadd.f32 %v146_v11, %v143_v14  ;;  %v159_v20 = vstv %s268_s18  ;;  %s274_s1 = sld [smem:[#allocation2 + $0x25]] }
  0x3a   :  { %v160_v22 = vmul.f32 %v159_v20, %v371_v33  ;;  %v164_v23 = vstv %s269_s19  ;;  %s275_s24 = sld [smem:[#allocation2 + $0x26]]  ;;  %v137_v28 = vmax.f32 %v136_v17, 0.0 }
  0x3b   :  { %v151_v25 = vadd.f32 %v150_v15, %v147_v18  ;;  %v165_v26 = vmul.f32 %v164_v23, %v375_v37  ;;  %v168_v27 = vstv %s270_s20  ;;  %s403_s25 = sld [smem:[#allocation2 + $0x27]] }
  0x3c   :  { %v162_v29 = vadd.f32 %v161_v21, %v160_v22  ;;  %v169_v30 = vmul.f32 %v168_v27, %v380_v45  ;;  %v172_v31 = vstv %s271_s21  ;;  %s406_s26 = sld [smem:[#allocation2 + $0x2d]] }
  0x3d   :  { %v155_v32 = vadd.f32 %v154_v19, %v151_v25  ;;  %s278_s27 = sld [smem:[#allocation2 + $0x28]]  ;;  %v173_v34 = vmul.f32 %v172_v31, %v99_v54  ;;  %v180_v36 = vstv %s398_s22  ;;  %v195_v54 = vlaneseq }
  0x3e   :  { %v166_v33 = vadd.f32 %v165_v26, %v162_v29  ;;  %v178_v35 = vstv %s273_s23  ;;  %s279_s28 = sld [smem:[#allocation2 + $0x29]] }
  0x3f   :  { %v156_v37 = vmax.f32 %v155_v32, 0.0  ;;  %v179_v38 = vmul.f32 %v178_v35, %v118_v24  ;;  %v183_v39 = vstv %s274_s1  ;;  %s280_s29 = sld [smem:[#allocation2 + $0x2a]]  ;;  %vm197_vm0 = vcmp.lt.s32.totalorder %v195_v54, 512 }
  0x40   :  { %v170_v40 = vadd.f32 %v169_v30, %v166_v33  ;;  %v184_v41 = vmul.f32 %v183_v39, %v137_v28  ;;  %v187_v42 = vstv %s275_s24  ;;  %s281_s30 = sld [smem:[#allocation2 + $0x2b]] }
  0x41   :  { %v181_v43 = vadd.f32 %v180_v36, %v179_v38  ;;  %v188_v44 = vmul.f32 %v187_v42, %v156_v37  ;;  %v191_v47 = vstv %s403_s25 }
  0x42   :  { %v174_v45 = vadd.f32 %v173_v34, %v170_v40  ;;  %v204_v49 = vstv %s406_s26 }
  0x43   :  { %v185_v46 = vadd.f32 %v184_v41, %v181_v43  ;;  %v202_v48 = vstv %s278_s27 }
  0x44   :  { %v175_v50 = vmax.f32 %v174_v45, 0.0  ;;  %v203_v51 = vmul.f32 %v202_v48, %v118_v24  ;;  %v207_v52 = vstv %s279_s28 }
  0x45   :  { %v189_v53 = vadd.f32 %v188_v44, %v185_v46  ;;  %v208_v55 = vmul.f32 %v207_v52, %v137_v28  ;;  %v211_v56 = vstv %s280_s29 }
  0x46   :  { %v192_v57 = vmul.f32 %v191_v47, %v175_v50  ;;  %v205_v58 = vadd.f32 %v204_v49, %v203_v51  ;;  %v212_v59 = vmul.f32 %v211_v56, %v156_v37  ;;  %v215_v60 = vstv %s281_s30 }
  0x47   :  { %v216_v63 = vmul.f32 %v215_v60, %v175_v50 }
  0x48   :  { %v193_v61 = vadd.f32 %v192_v57, %v189_v53  ;;  %v209_v62 = vadd.f32 %v208_v55, %v205_v58 }
  0x4a   :  { %v194_v0 = vmax.f32 %v193_v61, 0.0  ;;  %v213_v1 = vadd.f32 %v212_v59, %v209_v62 }
  0x4c   :  { %199 = vst.msk [vmem:[#allocation7] ss:$2 sm:$0xf] %vm197_vm0, %v194_v0  ;;  %v217_v2 = vadd.f32 %v216_v63, %v213_v1 }
  0x4e   :  { %v218_v3 = vmax.f32 %v217_v2, 0.0 }
  0x50   :  { %220 = vst.msk [vmem:[#allocation7 + $0x1] ss:$2 sm:$0xf] %vm197_vm0, %v218_v3 }
  0x51   :  { %324 = shalt.err (!%p321_p9)
}
  0x52   :  { %230 = dma.vmem_to_hbm [thread:$0]  %s228_s4, 128, %s416_s2, [#allocation4]  }
  0x53   :  { %337 = dma.done.wait [#allocation4], 128  }
  0x54   :  { %338 = vsyncadd [#allocation4], 4294967168 }
  0x55   :  { %234 = vsyncpa [#allocation3], 1 }
  0x56   :  { %235 = vsyncpa [#allocation4], 1 }
  0x57   :  { %236 = vsyncpa [#allocation5], 1 }

</bundles_post_ra>
